<compile_context>
chip_gen: v6e
topology: v6e:2x2x1
jax: 0.10.0
libtpu: 0.0.40
codegen_flags: <defaults>
</compile_context>

<pallas_src>
import functools

import jax
import jax.numpy as jnp
from jax.experimental import pallas as pl
from jax.experimental.pallas import tpu as pltpu

LANES = 128
DEFAULT_ROWS_PER_TILE = 512  # 512 * 128 = 65536 samples / step, ~1 MiB per bbox tile


def _iou_loss_kernel(fb_ref, lb_ref, w_ref, out_ref, num_acc, den_acc, *, n, tr):
    i = pl.program_id(0)

    @pl.when(i == 0)
    def _():
        num_acc[...] = jnp.zeros_like(num_acc)
        den_acc[...] = jnp.zeros_like(den_acc)

    # (tr, 128) planes, cast to f32 in-kernel.
    f_l = fb_ref[0].astype(jnp.float32)
    f_t = fb_ref[1].astype(jnp.float32)
    f_r = fb_ref[2].astype(jnp.float32)
    f_b = fb_ref[3].astype(jnp.float32)
    l_l = lb_ref[0].astype(jnp.float32)
    l_t = lb_ref[1].astype(jnp.float32)
    l_r = lb_ref[2].astype(jnp.float32)
    l_b = lb_ref[3].astype(jnp.float32)
    w = w_ref[...].astype(jnp.float32)

    f_area = (f_l + f_r) * (f_t + f_b)
    l_area = (l_l + l_r) * (l_t + l_b)
    w_int = jnp.minimum(f_l, l_l) + jnp.minimum(f_r, l_r)
    h_int = jnp.minimum(f_t, l_t) + jnp.minimum(f_b, l_b)
    inter = w_int * h_int
    union = f_area + l_area - inter
    # Torch ref's `area_union.clamp(min=eps)` is a no-op -> no clamp here.

    # Validity mask for the padded ragged tail (generated in-kernel, no HBM cost).
    r = jax.lax.broadcasted_iota(jnp.int32, (tr, LANES), 0)
    c = jax.lax.broadcasted_iota(jnp.int32, (tr, LANES), 1)
    valid = (i * tr + r) * LANES + c < n

    iou = inter / jnp.where(valid, union, 1.0)
    iou = jnp.where(valid, iou, 1.0)          # -> loss contribution 0 when invalid
    loss = -jnp.log(iou)
    wv = jnp.where(valid, w, 0.0)

    # Pure VPU elementwise accumulation; no per-step cross-lane reduce.
    num_acc[...] += loss * wv
    den_acc[...] += wv

    @pl.when(i == pl.num_programs(0) - 1)
    def _():
        out_ref[0, 0] = jnp.sum(num_acc[...]) / jnp.sum(den_acc[...])


def iou_loss(bbox_pred_pos, regress_target_pos, weight_pos,
             *, rows_per_tile=DEFAULT_ROWS_PER_TILE):
    assert bbox_pred_pos.shape == regress_target_pos.shape
    n = bbox_pred_pos.shape[0]
    assert bbox_pred_pos.shape == (n, 4)
    w = weight_pos.reshape(-1)
    assert w.shape[0] == n

    # Lane-dense layout: (N, 4) -> (4, N) (one transpose pass), then free reshapes.
    fb = bbox_pred_pos.T
    lb = regress_target_pos.T

    tile_elems = rows_per_tile * LANES
    if n <= tile_elems:
        n_pad = pl.cdiv(n, LANES) * LANES
        tr = n_pad // LANES          # block == full sublane extent, grid of 1
        grid = 1
    else:
        n_pad = pl.cdiv(n, tile_elems) * tile_elems
        tr = rows_per_tile
        grid = n_pad // tile_elems

    if n_pad != n:  # pad only the small ragged tail; values are masked in-kernel
        fb = jnp.pad(fb, ((0, 0), (0, n_pad - n)))
        lb = jnp.pad(lb, ((0, 0), (0, n_pad - n)))
        w = jnp.pad(w, (0, n_pad - n))

    rows = n_pad // LANES
    fb3 = fb.reshape(4, rows, LANES)
    lb3 = lb.reshape(4, rows, LANES)
    w2 = w.reshape(rows, LANES)

    kernel = functools.partial(_iou_loss_kernel, n=n, tr=tr)

    out = pl.pallas_call(
        kernel,
        out_shape=jax.ShapeDtypeStruct((1, 1), jnp.float32),
        grid_spec=pltpu.PrefetchScalarGridSpec(
            num_scalar_prefetch=0,
            grid=(grid,),
            in_specs=[
                pl.BlockSpec((4, tr, LANES), lambda i: (0, i, 0)),
                pl.BlockSpec((4, tr, LANES), lambda i: (0, i, 0)),
                pl.BlockSpec((tr, LANES), lambda i: (i, 0)),
            ],
            out_specs=pl.BlockSpec(
                (1, 1), lambda i: (0, 0), memory_space=pltpu.SMEM
            ),
            scratch_shapes=[
                pltpu.VMEM((tr, LANES), jnp.float32),  # sum(-log(iou) * w) partials
                pltpu.VMEM((tr, LANES), jnp.float32),  # sum(w) partials
            ],
        ),
        compiler_params=pltpu.CompilerParams(
            dimension_semantics=("arbitrary",),
        ),
    )(fb3, lb3, w2)
    return out[0, 0]


def _reference(fb, lb, w):
    f_l, f_t, f_r, f_b = fb[:, 0], fb[:, 1], fb[:, 2], fb[:, 3]
    l_l, l_t, l_r, l_b = lb[:, 0], lb[:, 1], lb[:, 2], lb[:, 3]
    f_area = (f_l + f_r) * (f_t + f_b)
    l_area = (l_l + l_r) * (l_t + l_b)
    w_int = jnp.minimum(f_l, l_l) + jnp.minimum(f_r, l_r)
    h_int = jnp.minimum(f_t, l_t) + jnp.minimum(f_b, l_b)
    inter = w_int * h_int
    union = f_area + l_area - inter      # clamp in the torch ref is a no-op
    iou = inter / union
    loss = -jnp.log(iou)
    return (loss * w).sum() / w.sum()


if __name__ == "__main__":
    key = jax.random.PRNGKey(0)
    k1, k2, k3 = jax.random.split(key, 3)
    # Small shape consistent with the module: N positive samples, ltrb boxes [N, 4].
    N = 100  # non-multiple of 128 to exercise the in-kernel tail masking
    bbox_pred = jax.random.uniform(k1, (N, 4), jnp.float32, minval=0.1, maxval=1.0)
    bbox_tgt = jax.random.uniform(k2, (N, 4), jnp.float32, minval=0.1, maxval=1.0)
    weight = jax.random.uniform(k3, (N,), jnp.float32, minval=0.1, maxval=1.0)

    out = iou_loss(bbox_pred, bbox_tgt, weight)
    out = jax.block_until_ready(out)

    ref = _reference(bbox_pred, bbox_tgt, weight)
    assert jnp.allclose(out, ref, atol=1e-5, rtol=1e-5), (out, ref)
    print("KERNEL_OK")
</pallas_src>

<mosaic_0001>
module attributes {stable_mosaic.version = 11 : i64} {
  func.func @_iou_loss_kernel(%arg0: i32, %arg1: memref<4x1x128xf32, #tpu.memory_space<vmem>>, %arg2: memref<4x1x128xf32, #tpu.memory_space<vmem>>, %arg3: memref<1x128xf32, #tpu.memory_space<vmem>>, %arg4: memref<1x1xf32, #tpu.memory_space<smem>>, %arg5: memref<1x128xf32, #tpu.memory_space<vmem>>, %arg6: memref<1x128xf32, #tpu.memory_space<vmem>>) attributes {dimension_semantics = [#tpu.dimension_semantics<arbitrary>], iteration_bounds = array<i64: 1>, scalar_prefetch = 0 : i64, scratch_operands = 2 : i64, tpu.core_type = #tpu.core_type<tc>, window_params = [{transform_indices = @transform_0, window_bounds = array<i64: 4, 1, 128>}, {transform_indices = @transform_1, window_bounds = array<i64: 4, 1, 128>}, {transform_indices = @transform_2, window_bounds = array<i64: 1, 128>}, {transform_indices = @transform_3, window_bounds = array<i64: 1, 1>}]} {
    %c0_i32 = arith.constant 0 : i32
    %0 = arith.cmpi eq, %arg0, %c0_i32 : i32
    %1 = arith.extui %0 : i1 to i32
    %c0_i32_0 = arith.constant 0 : i32
    %2 = arith.cmpi ne, %1, %c0_i32_0 : i32
    scf.if %2 {
      %cst_36 = arith.constant 0.000000e+00 : f32
      %65 = vector.broadcast %cst_36 : f32 to vector<1x128xf32>
      %c0_37 = arith.constant 0 : index
      %c0_38 = arith.constant 0 : index
      %66 = vector.load %arg5[%c0_37, %c0_38] : memref<1x128xf32, #tpu.memory_space<vmem>>, vector<1x128xf32>
      tpu.vector_store %arg5[%c0_37, %c0_38], %65 {strides = array<i32>} : memref<1x128xf32, #tpu.memory_space<vmem>>, vector<1x128xf32>,
      %cst_39 = arith.constant 0.000000e+00 : f32
      %67 = vector.broadcast %cst_39 : f32 to vector<1x128xf32>
      %c0_40 = arith.constant 0 : index
      %c0_41 = arith.constant 0 : index
      %68 = vector.load %arg6[%c0_40, %c0_41] : memref<1x128xf32, #tpu.memory_space<vmem>>, vector<1x128xf32>
      tpu.vector_store %arg6[%c0_40, %c0_41], %67 {strides = array<i32>} : memref<1x128xf32, #tpu.memory_space<vmem>>, vector<1x128xf32>,
    } else {
    }
    %c0 = arith.constant 0 : index
    %c0_1 = arith.constant 0 : index
    %c0_2 = arith.constant 0 : index
    %3 = vector.load %arg1[%c0, %c0_1, %c0_2] : memref<4x1x128xf32, #tpu.memory_space<vmem>>, vector<1x1x128xf32>
    %4 = vector.shape_cast %3 : vector<1x1x128xf32> to vector<1x128xf32>
    %c1 = arith.constant 1 : index
    %c0_3 = arith.constant 0 : index
    %c0_4 = arith.constant 0 : index
    %5 = vector.load %arg1[%c1, %c0_3, %c0_4] : memref<4x1x128xf32, #tpu.memory_space<vmem>>, vector<1x1x128xf32>
    %6 = vector.shape_cast %5 : vector<1x1x128xf32> to vector<1x128xf32>
    %c2 = arith.constant 2 : index
    %c0_5 = arith.constant 0 : index
    %c0_6 = arith.constant 0 : index
    %7 = vector.load %arg1[%c2, %c0_5, %c0_6] : memref<4x1x128xf32, #tpu.memory_space<vmem>>, vector<1x1x128xf32>
    %8 = vector.shape_cast %7 : vector<1x1x128xf32> to vector<1x128xf32>
    %c3 = arith.constant 3 : index
    %c0_7 = arith.constant 0 : index
    %c0_8 = arith.constant 0 : index
    %9 = vector.load %arg1[%c3, %c0_7, %c0_8] : memref<4x1x128xf32, #tpu.memory_space<vmem>>, vector<1x1x128xf32>
    %10 = vector.shape_cast %9 : vector<1x1x128xf32> to vector<1x128xf32>
    %c0_9 = arith.constant 0 : index
    %c0_10 = arith.constant 0 : index
    %c0_11 = arith.constant 0 : index
    %11 = vector.load %arg2[%c0_9, %c0_10, %c0_11] : memref<4x1x128xf32, #tpu.memory_space<vmem>>, vector<1x1x128xf32>
    %12 = vector.shape_cast %11 : vector<1x1x128xf32> to vector<1x128xf32>
    %c1_12 = arith.constant 1 : index
    %c0_13 = arith.constant 0 : index
    %c0_14 = arith.constant 0 : index
    %13 = vector.load %arg2[%c1_12, %c0_13, %c0_14] : memref<4x1x128xf32, #tpu.memory_space<vmem>>, vector<1x1x128xf32>
    %14 = vector.shape_cast %13 : vector<1x1x128xf32> to vector<1x128xf32>
    %c2_15 = arith.constant 2 : index
    %c0_16 = arith.constant 0 : index
    %c0_17 = arith.constant 0 : index
    %15 = vector.load %arg2[%c2_15, %c0_16, %c0_17] : memref<4x1x128xf32, #tpu.memory_space<vmem>>, vector<1x1x128xf32>
    %16 = vector.shape_cast %15 : vector<1x1x128xf32> to vector<1x128xf32>
    %c3_18 = arith.constant 3 : index
    %c0_19 = arith.constant 0 : index
    %c0_20 = arith.constant 0 : index
    %17 = vector.load %arg2[%c3_18, %c0_19, %c0_20] : memref<4x1x128xf32, #tpu.memory_space<vmem>>, vector<1x1x128xf32>
    %18 = vector.shape_cast %17 : vector<1x1x128xf32> to vector<1x128xf32>
    %c0_21 = arith.constant 0 : index
    %c0_22 = arith.constant 0 : index
    %19 = vector.load %arg3[%c0_21, %c0_22] : memref<1x128xf32, #tpu.memory_space<vmem>>, vector<1x128xf32>
    %20 = arith.addf %4, %8 : vector<1x128xf32>
    %21 = arith.addf %6, %10 : vector<1x128xf32>
    %22 = arith.mulf %20, %21 : vector<1x128xf32>
    %23 = arith.addf %12, %16 : vector<1x128xf32>
    %24 = arith.addf %14, %18 : vector<1x128xf32>
    %25 = arith.mulf %23, %24 : vector<1x128xf32>
    %26 = arith.minimumf %4, %12 : vector<1x128xf32>
    %27 = arith.minimumf %8, %16 : vector<1x128xf32>
    %28 = arith.addf %26, %27 : vector<1x128xf32>
    %29 = arith.minimumf %6, %14 : vector<1x128xf32>
    %30 = arith.minimumf %10, %18 : vector<1x128xf32>
    %31 = arith.addf %29, %30 : vector<1x128xf32>
    %32 = arith.mulf %28, %31 : vector<1x128xf32>
    %33 = arith.addf %22, %25 : vector<1x128xf32>
    %34 = arith.subf %33, %32 : vector<1x128xf32>
    %35 = tpu.iota {dimensions = array<i32: 0>} : vector<1x128xi32>
    %36 = tpu.iota {dimensions = array<i32: 1>} : vector<1x128xi32>
    %c1_i32 = arith.constant 1 : i32
    %37 = arith.muli %arg0, %c1_i32 : i32
    %38 = vector.broadcast %37 : i32 to vector<1x128xi32>
    %39 = arith.addi %38, %35 : vector<1x128xi32>
    %c128_i32 = arith.constant 128 : i32
    %40 = vector.broadcast %c128_i32 : i32 to vector<1x128xi32>
    %41 = arith.muli %39, %40 : vector<1x128xi32>
    %42 = arith.addi %41, %36 : vector<1x128xi32>
    %c100_i32 = arith.constant 100 : i32
    %43 = vector.broadcast %c100_i32 : i32 to vector<1x128xi32>
    %44 = arith.cmpi slt, %42, %43 : vector<1x128xi32>
    %cst = arith.constant 1.000000e+00 : f32
    %45 = vector.broadcast %cst : f32 to vector<1x128xf32>
    %46 = arith.select %44, %34, %45 : vector<1x128xi1>, vector<1x128xf32>
    %47 = arith.divf %32, %46 : vector<1x128xf32>
    %cst_23 = arith.constant 1.000000e+00 : f32
    %48 = vector.broadcast %cst_23 : f32 to vector<1x128xf32>
    %49 = arith.select %44, %47, %48 : vector<1x128xi1>, vector<1x128xf32>
    %50 = math.log %49 : vector<1x128xf32>
    %cst_24 = arith.constant 0.000000e+00 : f32
    %51 = vector.broadcast %cst_24 : f32 to vector<1x128xf32>
    %52 = arith.subf %51, %50 : vector<1x128xf32>
    %cst_25 = arith.constant 0.000000e+00 : f32
    %53 = vector.broadcast %cst_25 : f32 to vector<1x128xf32>
    %54 = arith.select %44, %19, %53 : vector<1x128xi1>, vector<1x128xf32>
    %c0_26 = arith.constant 0 : index
    %c0_27 = arith.constant 0 : index
    %55 = vector.load %arg5[%c0_26, %c0_27] : memref<1x128xf32, #tpu.memory_space<vmem>>, vector<1x128xf32>
    %56 = arith.mulf %52, %54 : vector<1x128xf32>
    %57 = arith.addf %55, %56 : vector<1x128xf32>
    %c0_28 = arith.constant 0 : index
    %c0_29 = arith.constant 0 : index
    %58 = vector.load %arg5[%c0_28, %c0_29] : memref<1x128xf32, #tpu.memory_space<vmem>>, vector<1x128xf32>
    tpu.vector_store %arg5[%c0_28, %c0_29], %57 {strides = array<i32>} : memref<1x128xf32, #tpu.memory_space<vmem>>, vector<1x128xf32>,
    %c0_30 = arith.constant 0 : index
    %c0_31 = arith.constant 0 : index
    %59 = vector.load %arg6[%c0_30, %c0_31] : memref<1x128xf32, #tpu.memory_space<vmem>>, vector<1x128xf32>
    %60 = arith.addf %59, %54 : vector<1x128xf32>
    %c0_32 = arith.constant 0 : index
    %c0_33 = arith.constant 0 : index
    %61 = vector.load %arg6[%c0_32, %c0_33] : memref<1x128xf32, #tpu.memory_space<vmem>>, vector<1x128xf32>
    tpu.vector_store %arg6[%c0_32, %c0_33], %60 {strides = array<i32>} : memref<1x128xf32, #tpu.memory_space<vmem>>, vector<1x128xf32>,
    %c0_i32_34 = arith.constant 0 : i32
    %62 = arith.cmpi eq, %arg0, %c0_i32_34 : i32
    %63 = arith.extui %62 : i1 to i32
    %c0_i32_35 = arith.constant 0 : i32
    %64 = arith.cmpi ne, %63, %c0_i32_35 : i32
    scf.if %64 {
      %c0_36 = arith.constant 0 : index
      %c0_37 = arith.constant 0 : index
      %65 = vector.load %arg5[%c0_36, %c0_37] : memref<1x128xf32, #tpu.memory_space<vmem>>, vector<1x128xf32>
      %66 = vector.shape_cast %65 : vector<1x128xf32> to vector<1x1x128xf32>
      %cst_38 = arith.constant dense<0.000000e+00> : vector<1xf32>
      %67 = vector.multi_reduction <add>, %66, %cst_38 [1, 2] : vector<1x1x128xf32> to vector<1xf32>
      %68 = vector.shape_cast %67 : vector<1xf32> to vector<1x1x1xf32>
      %69 = vector.extract %68[0, 0, 0] : f32 from vector<1x1x1xf32>
      %c0_39 = arith.constant 0 : index
      %c0_40 = arith.constant 0 : index
      %70 = vector.load %arg6[%c0_39, %c0_40] : memref<1x128xf32, #tpu.memory_space<vmem>>, vector<1x128xf32>
      %71 = vector.shape_cast %70 : vector<1x128xf32> to vector<1x1x128xf32>
      %cst_41 = arith.constant dense<0.000000e+00> : vector<1xf32>
      %72 = vector.multi_reduction <add>, %71, %cst_41 [1, 2] : vector<1x1x128xf32> to vector<1xf32>
      %73 = vector.shape_cast %72 : vector<1xf32> to vector<1x1x1xf32>
      %74 = vector.extract %73[0, 0, 0] : f32 from vector<1x1x1xf32>
      %75 = arith.divf %69, %74 : f32
      %c0_42 = arith.constant 0 : index
      %c0_43 = arith.constant 0 : index
      %76 = memref.load %arg4[%c0_42, %c0_43] : memref<1x1xf32, #tpu.memory_space<smem>>
      memref.store %75, %arg4[%c0_42, %c0_43] : memref<1x1xf32, #tpu.memory_space<smem>>
    } else {
    }
    return
  }
  func.func @transform_0(%arg0: i32) -> (i32, i32, i32) {
    %c0_i32 = arith.constant 0 : i32
    %c0_i32_0 = arith.constant 0 : i32
    %c0_i32_1 = arith.constant 0 : i32
    return %c0_i32, %arg0, %c0_i32_0 : i32, i32, i32
  }
  func.func @transform_1(%arg0: i32) -> (i32, i32, i32) {
    %c0_i32 = arith.constant 0 : i32
    %c0_i32_0 = arith.constant 0 : i32
    %c0_i32_1 = arith.constant 0 : i32
    return %c0_i32, %arg0, %c0_i32_0 : i32, i32, i32
  }
  func.func @transform_2(%arg0: i32) -> (i32, i32) {
    %c0_i32 = arith.constant 0 : i32
    %c0_i32_0 = arith.constant 0 : i32
    return %arg0, %c0_i32 : i32, i32
  }
  func.func @transform_3(%arg0: i32) -> (i32, i32) {
    %c0_i32 = arith.constant 0 : i32
    %c0_i32_0 = arith.constant 0 : i32
    %c0_i32_1 = arith.constant 0 : i32
    return %c0_i32, %c0_i32_0 : i32, i32
  }
}

</mosaic_0001>

<bundles_post_ra>
// kernel: tpu_custom_call.1
= control target key start
LH: loop header
LB: loop body
LE: loop exit
PB: predicated region body
PF: predicated region fallthrough
CT: control target
= control target key end

     0   :  { %8 = vsyncpa [#allocation5], 0  ;;  %s260_s0 = inlined_call_operand.hbm [shape: f32[4,1,128], index: 0, kind: input, shape index: {}]   ;;  %s261_s1 = inlined_call_operand.hbm [shape: f32[4,1,128], index: 1, kind: input, shape index: {}]   ;;  %s262_s2 = inlined_call_operand.vmem [shape: f32[1,128], index: 2, kind: input, shape index: {}]   ;;  %s263_s3 = inlined_call_operand.hbm [shape: f32[1,1], index: 3, kind: output, shape index: {}]  }
   0x1   :  { %9 = vsyncpa [#allocation8], 0 }
   0x2   :  { %10 = vsyncpa [#allocation6], 0  ;;  %s222_s12 = smov [#allocation4]  }
   0x3   :  { %s16_s13 = sshll.u32 %s222_s12, 4  ;;  %s17_s13 = int_to_ptr.vmem [resolvable:$true] %s16_s13 }
   0x4   :  { %s176_s14 = scalar_lea.vmem %s17_s13, 64  ;;  %p181_p1 = scmp.lt.s32.totalorder %s17_s13, %s17_s13 }
   0x5   :  { %p177_p0 = scmp.ne.s32.totalorder %s17_s13, %s176_s14  ;;  %p182_p2 = scmp.lt.s32.totalorder %s176_s14, %s176_s14 }
   0x7   :  { %p183_p3 = por %p182_p2, %p181_p1 }
   0x9   :  { %p184_p4 = pnand %p183_p3, %p177_p0 }
   0xb   :  { %187 = shalt.err (!%p184_p4)
}
   0xc   :  { %s223_s15 = smov 16   ;;  %s224_s16 = smov 1  }
   0xd   :  { %22 = dma.hbm_to_vmem [thread:$0]  %s260_s0, 64, %s17_s13, [#allocation5], %s223_s15, %s223_s15, %s224_s16  }
   0xe   :  { %s225_s19 = smov [#allocation7]  }
   0xf   :  { %s28_s20 = sshll.u32 %s225_s19, 4  ;;  %s29_s20 = int_to_ptr.vmem [resolvable:$true] %s28_s20 }
  0x10   :  { %s196_s21 = scalar_lea.vmem %s29_s20, 64  ;;  %p201_p6 = scmp.lt.s32.totalorder %s29_s20, %s29_s20 }
  0x11   :  { %p197_p5 = scmp.ne.s32.totalorder %s29_s20, %s196_s21  ;;  %p202_p7 = scmp.lt.s32.totalorder %s196_s21, %s196_s21 }
  0x13   :  { %p203_p8 = por %p202_p7, %p201_p6 }
  0x15   :  { %p204_p9 = pnand %p203_p8, %p197_p5 }
  0x17   :  { %207 = shalt.err (!%p204_p9)
}
  0x18   :  { %34 = dma.hbm_to_vmem [thread:$0]  %s261_s1, 64, %s29_s20, [#allocation8], %s223_s15, %s223_s15, %s224_s16  }
  0x19   :  { %216 = dma.done.wait [#allocation5], 64  }
  0x1a   :  { %217 = vsyncadd [#allocation5], 4294967232 }
  0x1b   :  { %218 = dma.done.wait [#allocation8], 64  }
  0x1c   :  { %219 = vsyncadd [#allocation8], 4294967232  ;;  %v79_v0 = vlaneseq  ;;  %v226_v1 = vmov 0.0   ;;  %v49_v5 = vld [vmem:[#allocation4] sm:$0x1]  ;;  %vm107_vm1 = vcmask 1040384  }
  0x1d   :  { %47 = vst [vmem:[#allocation2] sm:$0x1] %v226_v1  ;;  %48 = vst [vmem:[#allocation3] sm:$0x1] %v226_v1  ;;  %v51_v6 = vld [vmem:[#allocation4 + $0x1] sm:$0x1] }
  0x1e   :  { %v80_v2 = vshrl.u32 %v79_v0, 7  ;;  %v82_v3 = vand.u32 127, %v79_v0  ;;  %v53_v7 = vld [vmem:[#allocation4 + $0x2] sm:$0x1]  ;;  %v55_v9 = vld [vmem:[#allocation4 + $0x3] sm:$0x1] }
  0x1f   :  { %v56_v10 = vld [vmem:[#allocation7] sm:$0x1]  ;;  %v58_v11 = vld [vmem:[#allocation7 + $0x1] sm:$0x1]  ;;  %v64_v12 = vadd.f32 %v53_v7, %v49_v5  ;;  %v60_v13 = vld [vmem:[#allocation7 + $0x2] sm:$0x1]  ;;  %v65_v16 = vadd.f32 %v55_v9, %v51_v6 }
  0x20   :  { %v85_v4 = vmul.u32 128, %v80_v2  ;;  %v62_v14 = vld [vmem:[#allocation7 + $0x3] sm:$0x1]  ;;  %v63_v15 = vld [vmem:[%s262_s2] sm:$0x1]  ;;  %v70_v17 = vmin.f32 %v49_v5, %v56_v10  ;;  %v73_v18 = vmin.f32 %v51_v6, %v58_v11  ;;  %v67_v19 = vadd.f32 %v60_v13, %v56_v10  ;;  %s227_s27 = smov [#allocation9]  }
  0x21   :  { %v68_v20 = vadd.f32 %v62_v14, %v58_v11  ;;  %v71_v21 = vmin.f32 %v53_v7, %v60_v13  ;;  %v74_v22 = vmin.f32 %v55_v9, %v62_v14  ;;  %v66_v24 = vmul.f32 %v65_v16, %v64_v12 }
  0x22   :  { %v86_v8 = vadd.s32 %v85_v4, %v82_v3 }
  0x23   :  { %v69_v25 = vmul.f32 %v68_v20, %v67_v19  ;;  %v72_v26 = vadd.f32 %v71_v21, %v70_v17  ;;  %v75_v27 = vadd.f32 %v74_v22, %v73_v18 }
  0x24   :  { %v100_v23 = vld [vmem:[#allocation3] sm:$0x1]  ;;  %vm87_vm0 = vcmp.lt.s32.totalorder %v86_v8, 100  ;;  %v96_v40 = vld [vmem:[#allocation2] sm:$0x1] }
  0x25   :  { %v95_v28 = vsel %vm87_vm0, %v63_v15, 0.0  ;;  %v76_v30 = vmul.f32 %v75_v27, %v72_v26  ;;  %v77_v31 = vadd.f32 %v69_v25, %v66_v24 }
  0x26   :  { %v101_v29 = vadd.f32 %v100_v23, %v95_v28 }
  0x27   :  { %v78_v32 = vsub.f32 %v77_v31, %v76_v30 }
  0x28   :  { %102 = vst [vmem:[#allocation3] sm:$0x1] %v101_v29 }
  0x29   :  { %v88_v33 = vsel %vm87_vm0, %v78_v32, 1.0 }
  0x2a   :  { %162 = vrcp.f32 %v88_v33 }
  0x2f   :  { %v118_v44 = vld [vmem:[#allocation3] sm:$0x1] }
  0x30   :  { %v119_v46 = vsel %vm107_vm1, %v118_v44, 0.0 }
  0x37   :  { %v163_v34 = vpop.eup %162 }
  0x38   :  { %v90_v35 = vmul.f32 %v163_v34, %v76_v30 }
  0x3a   :  { %v91_v36 = vsel %vm87_vm0, %v90_v35, 1.0 }
  0x3b   :  { %164 = vlog2.f32 %v91_v36 }
  0x48   :  { %v165_v37 = vpop.eup %164 }
  0x49   :  { %v93_v38 = vmul.f32 0.6931472, %v165_v37 }
  0x4b   :  { %v94_v39 = vsub.f32 0.0, %v93_v38 }
  0x4d   :  { %v97_v41 = vmul.f32 %v95_v28, %v94_v39 }
  0x4f   :  { %v98_v42 = vadd.f32 %v97_v41, %v96_v40 }
  0x51   :  { %99 = vst [vmem:[#allocation2] sm:$0x1] %v98_v42 }
  0x58   :  { %v106_v43 = vld [vmem:[#allocation2] sm:$0x1] }
  0x59   :  { %v108_v45 = vsel %vm107_vm1, %v106_v43, 0.0 }
  0x5a   :  { %109 = vadd.xlane.f32.xlu0 %v108_v45 }
  0x5e   :  { %120 = vadd.xlane.f32.xlu0 %v119_v46 }
  0xe3   :  { %v110_v47 = vpop.xlane.xlu0 %109 }
  0xe4   :  { %v111_v48 = vrot.slane %v110_v47, 4 }
  0xe6   :  { %v112_v49 = vadd.f32 %v111_v48, %v110_v47 }
  0xe7   :  { %v121_v50 = vpop.xlane.xlu0 %120 }
  0xe8   :  { %v113_v51 = vrot.slane %v112_v49, 2  ;;  %v122_v52 = vrot.slane %v121_v50, 4 }
  0xea   :  { %v123_v53 = vadd.f32 %v122_v52, %v121_v50  ;;  %v114_v54 = vadd.f32 %v113_v51, %v112_v49 }
  0xec   :  { %v124_v55 = vrot.slane %v123_v53, 2  ;;  %v115_v56 = vrot.slane %v114_v54, 1 }
  0xee   :  { %v125_v57 = vadd.f32 %v124_v55, %v123_v53  ;;  %v116_v58 = vadd.f32 %v115_v56, %v114_v54 }
  0xf0   :  { %150 = vpush %v116_v58  ;;  %v126_v59 = vrot.slane %v125_v57, 1 }
  0xf2   :  { %v127_v60 = vadd.f32 %v126_v59, %v125_v57 }
  0xf4   :  { %152 = vpush %v127_v60 }
 0x121   :  { %s151_s2 = spop %150 }
 0x125   :  { %s153_s24 = spop %152 }
 0x126   :  { %v129_v61 = vstv %s153_s24 }
 0x127   :  { %166 = vrcp.f32 %v129_v61 }
 0x134   :  { %v167_v62 = vpop.eup %166 }
 0x135   :  { %154 = vpush %v167_v62 }
 0x166   :  { %s155_s25 = spop %154 }
 0x167   :  { %s132_s26 = smul.f32 %s155_s25, %s151_s2 }
 0x169   :  { %134 = sst [smem:[#allocation9]] %s132_s26 }
 0x16a   :  { %142 = dma.smem_to_hbm %s227_s27, 16, %s263_s3, [#allocation6]  }
 0x16b   :  { %220 = dma.done.wait [#allocation6], 16  }
 0x16c   :  { %221 = vsyncadd [#allocation6], 4294967280 }
 0x16d   :  { %146 = sfence }
 0x16e   :  { %147 = vsyncpa [#allocation5], 1 }
 0x16f   :  { %148 = vsyncpa [#allocation8], 1 }
 0x170   :  { %149 = vsyncpa [#allocation6], 1 }

</bundles_post_ra>
